<compile_context>
chip_gen: v7x
topology: tpu7x:2x2x1
jax: 0.10.0
libtpu: 0.0.40
codegen_flags: <defaults>
</compile_context>

<pallas_src>
import jax
import jax.numpy as jnp
from jax import lax
from jax.experimental import pallas as pl
from jax.experimental.pallas import tpu as pltpu


def _round_up(v, m):
    return ((v + m - 1) // m) * m


def _ceil_div(a, b):
    return -(-a // b)


def _leaky_relu(x, slope):
    # max(x, slope*x) == LeakyReLU(slope) for 0 < slope < 1.
    return jnp.maximum(x, slope * x)


def mlp_kernel(x_ref, w1_ref, b1_ref, w2_ref, b2_ref, w3_ref, b3_ref, o_ref):
    """One batch-row tile of the 3-layer MLP. Params are VMEM-resident."""
    x = x_ref[...]                                                       # [TB, F]
    h = jnp.dot(x, w1_ref[...], preferred_element_type=jnp.float32)     # [TB, 32] f32 acc
    h = _leaky_relu(h + b1_ref[...], 0.1)
    h = jnp.dot(h.astype(w2_ref.dtype), w2_ref[...],
                preferred_element_type=jnp.float32)                     # [TB, 16]
    h = _leaky_relu(h + b2_ref[...], 0.5)
    # Lane-dense final layer: contract the 16-dim hidden axis with w3 as LHS so
    # the result is [T, TB] (batch in lanes) -> unmasked full-lane stores.
    out = lax.dot_general(w3_ref[...], h.astype(w3_ref.dtype),
                          dimension_numbers=(((0,), (1,)), ((), ())),
                          preferred_element_type=jnp.float32)           # [T, TB]
    o_ref[...] = (out + b3_ref[...]).astype(o_ref.dtype)                # b3 is [T, 1]


def _per_row_vmem_bytes(features, target_len, x_itemsize, out_itemsize):
    """Conservative VMEM bytes per batch row for one grid step."""
    f_pad = _round_up(features, 128)
    t_pad = _round_up(target_len, 8)
    return (2 * f_pad * x_itemsize        # double-buffered x tile (lane-padded)
            + 3 * 128 * 4                 # f32 hidden activations + cast temp (lane-padded)
            + 2 * t_pad * out_itemsize)   # double-buffered lane-dense out column


_TILE_VMEM_BUDGET = 28 << 20              # tiles + intermediates; safe inside v7x's 64 MiB


def _pick_batch_tile(batch, features, target_len, x_itemsize, out_itemsize,
                     vmem_budget_bytes=_TILE_VMEM_BUDGET):
    """Rows per grid step. Multiples of 128 keep the lane-dense (T, TB) output
    block legal; aim for >=2 (and even) grid steps so both v7x TCs get work."""
    if batch < 256:
        return batch                      # too small to split into 128-aligned tiles
    per_row = _per_row_vmem_bytes(features, target_len, x_itemsize, out_itemsize)
    max_rows = vmem_budget_bytes // per_row
    max_rows = max(128, min(max_rows, 32768))
    max_rows = (max_rows // 128) * 128
    if batch <= 2 * max_rows:
        # Exactly two steps -> each v7x TensorCore gets ~half the batch.
        return min(max_rows, _round_up(_ceil_div(batch, 2), 128))
    tb = max_rows
    steps = _ceil_div(batch, tb)
    if steps % 2:                         # prefer an even step count for megacore balance
        tb = min(tb, _round_up(_ceil_div(batch, steps + 1), 128))
    return tb


def _vmem_limit_bytes(tb, features, target_len, x_itemsize, out_itemsize, params):
    """Requested compiler VMEM limit: actual estimated usage + headroom, capped
    below the chip's physical VMEM."""
    est = tb * _per_row_vmem_bytes(features, target_len, x_itemsize, out_itemsize)
    for p in params:                      # resident (possibly double-buffered) params
        r = p.shape[0] if p.ndim >= 1 else 1
        c = p.shape[1] if p.ndim >= 2 else 1
        est += 2 * _round_up(r, 8) * _round_up(c, 128) * p.dtype.itemsize
    try:
        cap = int(pltpu.get_tpu_info().vmem_capacity_bytes)
    except Exception:                     # pragma: no cover - conservative fallback
        cap = 64 << 20
    return int(min(max(est + (8 << 20), 32 << 20), int(cap * 0.9)))


def neural_network_forward(x, params, *, batch_tile=None):
    """x: [B, ...] (flattened to [B, F]); returns logits [B, target_length]."""
    w1, b1, w2, b2, w3, b3 = params
    B = x.shape[0]
    xf = x.reshape(B, -1)                 # nn.Flatten(); layout-only, no HBM cast
    F = xf.shape[1]
    T = w3.shape[1]
    if w1.shape[0] != F:
        raise ValueError(f"feature_length mismatch: {w1.shape[0]} vs {F}")

    if batch_tile is not None:
        bt = max(int(batch_tile), 1)
        # Validate/round user tiles: multiples of 128 (lane-dense out) or full B.
        TB = B if bt >= B else min(B, max(128, (bt // 128) * 128))
    else:
        TB = _pick_batch_tile(B, F, T, xf.dtype.itemsize, xf.dtype.itemsize)
    grid = (pl.cdiv(B, TB),)

    b3_col = b3.reshape(T, 1)             # bias along sublanes for the (T, TB) out tile

    row_spec = pl.BlockSpec((TB, F), lambda i: (i, 0))        # batch-tiled input
    out_spec = pl.BlockSpec((T, TB), lambda i: (0, i))        # lane-dense output
    pinned = lambda shape: pl.BlockSpec(shape, lambda i: (0, 0))  # VMEM-resident params

    param_bytes = sum(p.size * p.dtype.itemsize for p in params)
    cost = pl.CostEstimate(
        flops=2 * B * (F * 32 + 32 * 16 + 16 * T),
        transcendentals=0,
        bytes_accessed=xf.size * xf.dtype.itemsize
        + B * T * xf.dtype.itemsize
        + param_bytes,
    )

    out_t = pl.pallas_call(
        mlp_kernel,
        out_shape=jax.ShapeDtypeStruct((T, B), xf.dtype),
        grid=grid,
        in_specs=[
            row_spec,
            pinned(w1.shape), pinned(b1.shape),
            pinned(w2.shape), pinned(b2.shape),
            pinned(w3.shape), pinned(b3_col.shape),
        ],
        out_specs=out_spec,
        compiler_params=pltpu.CompilerParams(
            dimension_semantics=("parallel",),        # shards batch over v7x's 2 TCs
            vmem_limit_bytes=_vmem_limit_bytes(
                TB, F, T, xf.dtype.itemsize, xf.dtype.itemsize, params),
        ),
        cost_estimate=cost,
    )(xf, w1, b1, w2, b2, w3, b3_col)

    # Tiny XLA transpose back to the PyTorch-facing (B, T) layout.
    return out_t.T


def init_params(key, feature_length, target_length):
    """Deterministic init mimicking nn.Linear's U(-1/sqrt(fan_in), 1/sqrt(fan_in))."""
    if not isinstance(feature_length, int) or not isinstance(target_length, int):
        raise ValueError('Feature and target lengths must be integers')
    if feature_length < 1 or target_length < 1:
        raise ValueError('Feature and target lengths must be greater than 0')

    dims = [(feature_length, 32), (32, 16), (16, target_length)]
    params = []
    for (fan_in, fan_out) in dims:
        key, kw, kb = jax.random.split(key, 3)
        bound = 1.0 / jnp.sqrt(jnp.float32(fan_in))
        w = jax.random.uniform(kw, (fan_in, fan_out), jnp.float32, -bound, bound)
        b = jax.random.uniform(kb, (1, fan_out), jnp.float32, -bound, bound)
        params += [w, b]
    return tuple(params)


def _reference_forward(x, params):
    w1, b1, w2, b2, w3, b3 = params
    xf = x.reshape(x.shape[0], -1)
    h = xf @ w1 + b1
    h = jnp.where(h > 0, h, 0.1 * h)
    h = h @ w2 + b2
    h = jnp.where(h > 0, h, 0.5 * h)
    return h @ w3 + b3


if __name__ == "__main__":
    key = jax.random.PRNGKey(0)
    B, C, H, W = 8, 4, 4, 4                  # input x: [8, 4, 4, 4]
    feature_length = C * H * W               # 64 after flatten
    target_length = 8

    key, kx = jax.random.split(key)
    x = jax.random.normal(kx, (B, C, H, W), jnp.float32)
    params = init_params(key, feature_length, target_length)

    # Small shape: single full-extent batch block.
    logits = neural_network_forward(x, params)
    jax.block_until_ready(logits)
    ref = _reference_forward(x, params)
    assert logits.shape == (B, target_length)
    assert jnp.allclose(logits, ref, atol=1e-5, rtol=1e-5)

    # Gridded path: 128-aligned batch tiles + ragged (masked) last tile,
    # lane-dense (T, TB) output blocks.
    key, kx2 = jax.random.split(key)
    x_big = jax.random.normal(kx2, (1100, feature_length), jnp.float32)
    logits_big = neural_network_forward(x_big, params, batch_tile=512)
    jax.block_until_ready(logits_big)
    ref_big = _reference_forward(x_big, params)
    assert logits_big.shape == (1100, target_length)
    assert jnp.allclose(logits_big, ref_big, atol=1e-4, rtol=1e-4)

    # Auto tile picker: two-step split so both v7x TensorCores get work.
    logits_auto = neural_network_forward(x_big, params)
    jax.block_until_ready(logits_auto)
    assert jnp.allclose(logits_auto, ref_big, atol=1e-4, rtol=1e-4)

    # bf16 end-to-end halves the dominant HBM read on v6e/v7x (matmuls still
    # accumulate in f32 inside the kernel); compare loosely against f32 ref.
    x_bf = x_big.astype(jnp.bfloat16)
    params_bf = tuple(p.astype(jnp.bfloat16) for p in params)
    logits_bf = neural_network_forward(x_bf, params_bf)
    jax.block_until_ready(logits_bf)
    assert logits_bf.shape == (1100, target_length)
    assert jnp.allclose(logits_bf.astype(jnp.float32), ref_big, atol=1e-1, rtol=1e-1)

    print("KERNEL_OK")
</pallas_src>

<mosaic_0001>
module attributes {stable_mosaic.version = 11 : i64} {
  func.func @mlp_kernel(%arg0: i32, %arg1: memref<8x64xf32, #tpu.memory_space<vmem>>, %arg2: memref<64x32xf32, #tpu.memory_space<vmem>>, %arg3: memref<1x32xf32, #tpu.memory_space<vmem>>, %arg4: memref<32x16xf32, #tpu.memory_space<vmem>>, %arg5: memref<1x16xf32, #tpu.memory_space<vmem>>, %arg6: memref<16x8xf32, #tpu.memory_space<vmem>>, %arg7: memref<8x1xf32, #tpu.memory_space<vmem>>, %arg8: memref<8x8xf32, #tpu.memory_space<vmem>>) attributes {dimension_semantics = [#tpu.dimension_semantics<parallel>], iteration_bounds = array<i64: 1>, scalar_prefetch = 0 : i64, scratch_operands = 0 : i64, tpu.core_type = #tpu.core_type<tc>, window_params = [{transform_indices = @transform_0, window_bounds = array<i64: 8, 64>}, {pipeline_mode = #tpu.pipeline_mode<synchronous>, transform_indices = @transform_1, window_bounds = array<i64: 64, 32>}, {pipeline_mode = #tpu.pipeline_mode<synchronous>, transform_indices = @transform_2, window_bounds = array<i64: 1, 32>}, {pipeline_mode = #tpu.pipeline_mode<synchronous>, transform_indices = @transform_3, window_bounds = array<i64: 32, 16>}, {pipeline_mode = #tpu.pipeline_mode<synchronous>, transform_indices = @transform_4, window_bounds = array<i64: 1, 16>}, {pipeline_mode = #tpu.pipeline_mode<synchronous>, transform_indices = @transform_5, window_bounds = array<i64: 16, 8>}, {pipeline_mode = #tpu.pipeline_mode<synchronous>, transform_indices = @transform_6, window_bounds = array<i64: 8, 1>}, {transform_indices = @transform_7, window_bounds = array<i64: 8, 8>}]} {
    %c0 = arith.constant 0 : index
    %c0_0 = arith.constant 0 : index
    %0 = vector.load %arg1[%c0, %c0_0] : memref<8x64xf32, #tpu.memory_space<vmem>>, vector<8x64xf32>
    %c0_1 = arith.constant 0 : index
    %c0_2 = arith.constant 0 : index
    %1 = vector.load %arg2[%c0_1, %c0_2] : memref<64x32xf32, #tpu.memory_space<vmem>>, vector<64x32xf32>
    %cst = arith.constant dense<0.000000e+00> : vector<8x32xf32>
    %2 = tpu.matmul %0, %1, %cst {dimension_numbers = #tpu.dot_dimension_numbers<[1], [0], [0], [1], [0, 0, 1, 1], [], []>} : vector<8x64xf32>, vector<64x32xf32>, vector<8x32xf32> -> vector<8x32xf32>
    %c0_3 = arith.constant 0 : index
    %c0_4 = arith.constant 0 : index
    %3 = vector.load %arg3[%c0_3, %c0_4] : memref<1x32xf32, #tpu.memory_space<vmem>>, vector<1x32xf32>
    %4 = vector.broadcast %3 : vector<1x32xf32> to vector<8x32xf32>
    %5 = arith.addf %2, %4 : vector<8x32xf32>
    %cst_5 = arith.constant 1.000000e-01 : f32
    %6 = vector.broadcast %cst_5 : f32 to vector<8x32xf32>
    %7 = arith.mulf %6, %5 : vector<8x32xf32>
    %8 = arith.maximumf %5, %7 : vector<8x32xf32>
    %c0_6 = arith.constant 0 : index
    %c0_7 = arith.constant 0 : index
    %9 = vector.load %arg4[%c0_6, %c0_7] : memref<32x16xf32, #tpu.memory_space<vmem>>, vector<32x16xf32>
    %cst_8 = arith.constant dense<0.000000e+00> : vector<8x16xf32>
    %10 = tpu.matmul %8, %9, %cst_8 {dimension_numbers = #tpu.dot_dimension_numbers<[1], [0], [0], [1], [0, 0, 1, 1], [], []>} : vector<8x32xf32>, vector<32x16xf32>, vector<8x16xf32> -> vector<8x16xf32>
    %c0_9 = arith.constant 0 : index
    %c0_10 = arith.constant 0 : index
    %11 = vector.load %arg5[%c0_9, %c0_10] : memref<1x16xf32, #tpu.memory_space<vmem>>, vector<1x16xf32>
    %12 = vector.broadcast %11 : vector<1x16xf32> to vector<8x16xf32>
    %13 = arith.addf %10, %12 : vector<8x16xf32>
    %cst_11 = arith.constant 5.000000e-01 : f32
    %14 = vector.broadcast %cst_11 : f32 to vector<8x16xf32>
    %15 = arith.mulf %14, %13 : vector<8x16xf32>
    %16 = arith.maximumf %13, %15 : vector<8x16xf32>
    %c0_12 = arith.constant 0 : index
    %c0_13 = arith.constant 0 : index
    %17 = vector.load %arg6[%c0_12, %c0_13] : memref<16x8xf32, #tpu.memory_space<vmem>>, vector<16x8xf32>
    %cst_14 = arith.constant dense<0.000000e+00> : vector<8x8xf32>
    %18 = tpu.matmul %17, %16, %cst_14 {dimension_numbers = #tpu.dot_dimension_numbers<[0], [1], [1], [0], [0, 1, 1, 0], [], []>} : vector<16x8xf32>, vector<8x16xf32>, vector<8x8xf32> -> vector<8x8xf32>
    %c0_15 = arith.constant 0 : index
    %c0_16 = arith.constant 0 : index
    %19 = vector.load %arg7[%c0_15, %c0_16] : memref<8x1xf32, #tpu.memory_space<vmem>>, vector<8x1xf32>
    %20 = vector.broadcast %19 : vector<8x1xf32> to vector<8x8xf32>
    %21 = arith.addf %18, %20 : vector<8x8xf32>
    %c0_17 = arith.constant 0 : index
    %c0_18 = arith.constant 0 : index
    %22 = vector.load %arg8[%c0_17, %c0_18] : memref<8x8xf32, #tpu.memory_space<vmem>>, vector<8x8xf32>
    tpu.vector_store %arg8[%c0_17, %c0_18], %21 {strides = array<i32>} : memref<8x8xf32, #tpu.memory_space<vmem>>, vector<8x8xf32>,
    return
  }
  func.func @transform_0(%arg0: i32) -> (i32, i32) {
    %c0_i32 = arith.constant 0 : i32
    %c0_i32_0 = arith.constant 0 : i32
    return %arg0, %c0_i32 : i32, i32
  }
  func.func @transform_1(%arg0: i32) -> (i32, i32) {
    %c0_i32 = arith.constant 0 : i32
    %c0_i32_0 = arith.constant 0 : i32
    %c0_i32_1 = arith.constant 0 : i32
    return %c0_i32, %c0_i32_0 : i32, i32
  }
  func.func @transform_2(%arg0: i32) -> (i32, i32) {
    %c0_i32 = arith.constant 0 : i32
    %c0_i32_0 = arith.constant 0 : i32
    %c0_i32_1 = arith.constant 0 : i32
    return %c0_i32, %c0_i32_0 : i32, i32
  }
  func.func @transform_3(%arg0: i32) -> (i32, i32) {
    %c0_i32 = arith.constant 0 : i32
    %c0_i32_0 = arith.constant 0 : i32
    %c0_i32_1 = arith.constant 0 : i32
    return %c0_i32, %c0_i32_0 : i32, i32
  }
  func.func @transform_4(%arg0: i32) -> (i32, i32) {
    %c0_i32 = arith.constant 0 : i32
    %c0_i32_0 = arith.constant 0 : i32
    %c0_i32_1 = arith.constant 0 : i32
    return %c0_i32, %c0_i32_0 : i32, i32
  }
  func.func @transform_5(%arg0: i32) -> (i32, i32) {
    %c0_i32 = arith.constant 0 : i32
    %c0_i32_0 = arith.constant 0 : i32
    %c0_i32_1 = arith.constant 0 : i32
    return %c0_i32, %c0_i32_0 : i32, i32
  }
  func.func @transform_6(%arg0: i32) -> (i32, i32) {
    %c0_i32 = arith.constant 0 : i32
    %c0_i32_0 = arith.constant 0 : i32
    %c0_i32_1 = arith.constant 0 : i32
    return %c0_i32, %c0_i32_0 : i32, i32
  }
  func.func @transform_7(%arg0: i32) -> (i32, i32) {
    %c0_i32 = arith.constant 0 : i32
    %c0_i32_0 = arith.constant 0 : i32
    return %c0_i32, %arg0 : i32, i32
  }
}

</mosaic_0001>

<bundles_post_ra>
// kernel: tpu_custom_call.1
= control target key start
LH: loop header
LB: loop body
LE: loop exit
PB: predicated region body
PF: predicated region fallthrough
CT: control target
= control target key end

     0   :  { %v445_v3 = vmov 0.0|0.0   ;;  %vm446_vm0 = vmmov 0   ;;  %v447_v6 = vmov 0.0   ;;  %s559_s0 = inlined_call_operand.vmem [shape: f32[8,64], index: 0, kind: input, shape index: {}]   ;;  %s560_s1 = inlined_call_operand.vmem [shape: f32[64,32], index: 1, kind: input, shape index: {}]   ;;  %s561_s2 = inlined_call_operand.vmem [shape: f32[1,32], index: 2, kind: input, shape index: {}]   ;;  %s562_s3 = inlined_call_operand.vmem [shape: f32[32,16], index: 3, kind: input, shape index: {}]   ;;  %s563_s4 = inlined_call_operand.vmem [shape: f32[1,16], index: 4, kind: input, shape index: {}]   ;;  %s564_s5 = inlined_call_operand.vmem [shape: f32[16,8], index: 5, kind: input, shape index: {}]   ;;  %s565_s6 = inlined_call_operand.vmem [shape: f32[8,1], index: 6, kind: input, shape index: {}]   ;;  %s566_s7 = inlined_call_operand.hbm [shape: f32[8,8], index: 7, kind: output, shape index: {}]  }
   0x1   :  { %v28_v0 = vld [vmem:[%s560_s1] sm:$0xff]  ;;  %v29_v1 = vld [vmem:[%s560_s1 + $0x8] sm:$0xff]  ;;  %v30_v2 = vld [vmem:[%s560_s1 + $0x10] sm:$0xff]  ;;  %396 = vmatprep.subr.bf16.mxu0 %v445_v3  ;;  %377 = vmatprep.mubr.msk.f32.mxu0 %vm446_vm0, %v447_v6 }
   0x2   :  { %v397_v4 = vpack.c.bf16 %v29_v1, %v28_v0  ;;  %v31_v5 = vld [vmem:[%s560_s1 + $0x18] sm:$0xff]  ;;  %408 = vmatprep.subr.bf16.mxu1 %v445_v3  ;;  %388 = vmatprep.mubr.msk.f32.mxu1 %vm446_vm0, %v447_v6 }
   0x3   :  { %v400_v7 = vpack.c.bf16 %v31_v5, %v30_v2 }
   0x4   :  { %398 = vmatpush3.bf16.msra.mxu0 %v397_v4 }
   0x5   :  { %12 = vsyncpa [#allocation3], 0  ;;  %399 = vmatprep.subr.bf16.mxu0 %v445_v3  ;;  %v32_v8 = vld [vmem:[%s560_s1 + $0x20] sm:$0xff]  ;;  %v33_v9 = vld [vmem:[%s560_s1 + $0x28] sm:$0xff]  ;;  %vm43_vm1 = vcmask 523264   ;;  %vm130_vm2 = vcmask 261120  }
   0x6   :  { %v403_v10 = vpack.c.bf16 %v33_v9, %v32_v8  ;;  %v34_v11 = vld [vmem:[%s560_s1 + $0x30] sm:$0xff]  ;;  %v35_v12 = vld [vmem:[%s560_s1 + $0x38] sm:$0xff]  ;;  %v27_v14 = vld [vmem:[%s559_s0] sm:$0xff]  ;;  %v448_v30 = vmov 0   ;;  %vm246_vm3 = vcmask 130048   ;;  %vm323_vm4 = vcmask 64512  }
   0x7   :  { %v406_v13 = vpack.c.bf16 %v35_v12, %v34_v11  ;;  %v119_v15 = vld [vmem:[%s562_s3] sm:$0xff]  ;;  %v120_v16 = vld [vmem:[%s562_s3 + $0x8] sm:$0xff]  ;;  %v121_v18 = vld [vmem:[%s562_s3 + $0x10] sm:$0xff]  ;;  %419 = vset.pattern.permute.xlu1 %v448_v30 }
   0x8   :  { %401 = vmatpush3.bf16.msra.mxu0 %v400_v7  ;;  %v409_v17 = vpack.c.bf16 %v120_v16, %v119_v15  ;;  %v122_v19 = vld [vmem:[%s562_s3 + $0x18] sm:$0xff]  ;;  %v206_v21 = vld [vmem:[%s564_s5] sm:$0xff]  ;;  %v207_v22 = vld [vmem:[%s564_s5 + $0x8] sm:$0xff] }
   0x9   :  { %402 = vmatprep.subr.bf16.mxu0 %v445_v3  ;;  %v412_v20 = vpack.c.bf16 %v122_v19, %v121_v18  ;;  %214 = vxpose.xlu0.b32.start [1/2] (short) (narrow) %v206_v21, 8  ;;  %v339_v23 = vld [vmem:[%s561_s2] ss:$0 sm:$0xff]  ;;  %s449_s2 = smov [#allocation2]  }
   0xa   :  { %410 = vmatpush3.bf16.msra.mxu1 %v409_v17  ;;  %v208_v29 = vld [vmem:[%s565_s6] sm:$0xff]  ;;  %s331_s6 = sshll.u32 %s449_s2, 4  ;;  %s332_s6 = int_to_ptr.vmem [resolvable:$true] %s331_s6 }
   0xb   :  { %411 = vmatprep.subr.bf16.mxu1 %v445_v3  ;;  %211 = vperm.xlu1 %419, %v208_v29   ;;  %v341_v31 = vld [vmem:[%s563_s4] ss:$0 sm:$0xff]  ;;  %s421_s10 = scalar_lea.vmem %s332_s6, 128  ;;  %p426_p1 = scmp.lt.s32.totalorder %s332_s6, %s332_s6 }
   0xc   :  { %404 = vmatpush3.bf16.msra.mxu0 %v403_v10  ;;  %p422_p0 = scmp.ne.s32.totalorder %s332_s6, %s421_s10  ;;  %p427_p2 = scmp.lt.s32.totalorder %s421_s10, %s421_s10 }
   0xd   :  { %405 = vmatprep.subr.bf16.mxu0 %v445_v3  ;;  %215 = vxpose.xlu0.b32.end [2/2] (short) (narrow) %v207_v22, 8 }
   0xe   :  { %413 = vmatpush3.bf16.msra.mxu1 %v412_v20  ;;  %p428_p3 = por %p427_p2, %p426_p1 }
   0xf   :  { %391 = vmatprep.subr.mxu1 %v447_v6 }
  0x10   :  { %407 = vmatpush3.bf16.msra.mxu0 %v406_v13  ;;  %p429_p4 = pnand %p428_p3, %p422_p0 }
  0x13   :  { %378 = vmatmul.mubr.msk.f32.vlgmr.msra.gmra.mrb[0].mxu0 %vm43_vm1, %v27_v14 }
  0x36   :  { %420 = vset.pattern.permute.xlu0 %v448_v30 }
  0x89   :  { %v230_v37 = vpop.trf.xlu0 }
  0x8a   :  { %v212_v38 = vpop.permute.xlu1 %211 }
  0xe6   :  { %v113_v24 = vpop.f32.mrb[0].mxu0 }
  0xe7   :  { %v114_v25 = vadd.f32 %v339_v23, %v113_v24  ;;  %v379_v26 = vpop.f32.mrb[1].mxu0 }
  0xe9   :  { %v117_v27 = vmul.f32 0.1, %v114_v25 }
  0xeb   :  { %v118_v28 = vmax.f32 %v114_v25, %v117_v27 }
  0xed   :  { %389 = vmatmul.mubr.msk.f32.vlgmr.msra.gmra.mrb[0].mxu1 %vm130_vm2, %v118_v28 }
  0xee   :  { %393 = vmatprep.mubr.msk.f32.mxu1 %vm446_vm0, %v447_v6 }
 0x1c0   :  { %v200_v32 = vpop.f32.mrb[0].mxu1 }
 0x1c1   :  { %v201_v33 = vadd.f32 %v341_v31, %v200_v32  ;;  %v390_v34 = vpop.f32.mrb[1].mxu1 }
 0x1c3   :  { %v204_v35 = vmul.f32 0.5, %v201_v33 }
 0x1c5   :  { %v205_v36 = vmax.f32 %v201_v33, %v204_v35 }
 0x1c7   :  { %392 = vmatpush3.xpose.msk.msra.mxu1 %vm246_vm3, %v205_v36 }
 0x1ca   :  { %394 = vmatmul.mubr.msk.f32.vlgmr.msra.gmra.mrb[2].mxu1 %vm246_vm3, %v230_v37 }
 0x29d   :  { %v319_v39 = vpop.f32.mrb[2].mxu1 }
 0x29e   :  { %v320_v40 = vadd.f32 %v319_v39, %v212_v38  ;;  %v395_v41 = vpop.f32.mrb[3].mxu1 }
 0x2a0   :  { %324 = vst.msk [vmem:[#allocation2] sm:$0xff] %vm323_vm4, %v320_v40 }
 0x2a1   :  { %432 = shalt.err (!%p429_p4)
}
 0x2a2   :  { %s433_s12 = scalar_lea.hbm %s566_s7, 128 }
 0x2a3   :  { %p434_p5 = scmp.ne.s32.totalorder %s566_s7, %s433_s12  ;;  %p437_p6 = scmp.lt.u32.totalorder %s433_s12, %s566_s7 }
 0x2a5   :  { %p439_p7 = pnand %p437_p6, %p434_p5 }
 0x2a7   :  { %442 = shalt.err (!%p439_p7)
}
 0x2a8   :  { %334 = dma.vmem_to_hbm [thread:$0]  %s332_s6, 128, %s566_s7, [#allocation3]  }
 0x2a9   :  { %443 = dma.done.wait [#allocation3], 128  }
 0x2aa   :  { %444 = vsyncadd [#allocation3], 4294967168 }
 0x2ab   :  { %338 = vsyncpa [#allocation3], 1 }

</bundles_post_ra>
